<compile_context>
chip_gen: v6e
topology: v6e:2x2x1
jax: 0.10.0
libtpu: 0.0.40
codegen_flags: <defaults>
</compile_context>

<pallas_src>
import jax
import jax.numpy as jnp
from jax import lax
from jax.experimental import pallas as pl
from jax.experimental.pallas import tpu as pltpu


EPS = 1e-5  # nn.LayerNorm default


def _patch_merge_kernel(x_ref, w_ref, b_ref, o_ref):
    """Fused 2x2 merge + LayerNorm(4C) + Linear(4C -> 2Cp) on one row-pair tile.

    x_ref: (tr, 2, W/2, 2C)  -- tr image row-pairs; axis 1 = row parity.
    w_ref: (4C, 2Cp)         -- gamma-folded, channel-permuted, col-padded.
    b_ref: (1, 2Cp)          -- beta @ W, col-padded (f32).
    o_ref: (tr * W/2, 2Cp)
    """
    blk = x_ref[...]                       # (tr, 2, Wh, 2C)
    xe = blk[:, 0]                         # even image rows -> [x0 | x2]
    xo = blk[:, 1]                         # odd  image rows -> [x1 | x3]
    m = jnp.concatenate([xe, xo], axis=-1).astype(jnp.float32)   # (tr, Wh, 4C)
    tr, wh, c4 = m.shape
    m2 = m.reshape(tr * wh, c4)            # merged rows of this tile

    # LayerNorm statistics over the 4C axis (biased variance, as in torch).
    mean = jnp.mean(m2, axis=-1, keepdims=True)
    cen = m2 - mean
    var = jnp.mean(cen * cen, axis=-1, keepdims=True)
    xn = cen * lax.rsqrt(var + EPS)

    # gamma/beta already folded into w_ref / b_ref.  MXU matmul (f32 acc).
    out = jnp.dot(xn.astype(w_ref.dtype), w_ref[...],
                  preferred_element_type=jnp.float32)
    out = out + b_ref[...].astype(jnp.float32)
    o_ref[...] = out.astype(o_ref.dtype)


def _choose_tr(num_rp, Wh, in_rp_bytes, out_rp_bytes, row_align,
               target_rows, vmem_budget):
    """Pick the number of image row-pairs per grid step.

    Constraints: divides num_rp (no ragged blocks), keeps the double-buffered
    in/out blocks under `vmem_budget`, targets ~`target_rows` merged rows per
    step, and keeps the output block row count sublane-aligned.
    """
    per_rp = 2 * in_rp_bytes + 2 * out_rp_bytes
    tr_cap = min(num_rp,
                 max(1, target_rows // max(Wh, 1)),
                 max(1, vmem_budget // max(per_rp, 1)))
    for tr in range(tr_cap, 0, -1):
        if num_rp % tr == 0 and ((tr * Wh) % row_align == 0 or tr == num_rp):
            return tr
    return num_rp


def patch_merging_pallas(x, gamma, beta, w_red, input_resolution, *,
                         mxu_dtype=None, target_rows=1024,
                         vmem_budget=12 << 20):
    """Forward pass of PatchMerging.

    Args:
      x:      (B, L, C) with L = H*W.
      gamma:  (4C,) LayerNorm weight.
      beta:   (4C,) LayerNorm bias.
      w_red:  (4C, 2C) reduction weight (torch stores (2C, 4C); this is the
              transposed version so the math is y @ w_red).
      input_resolution: (H, W).
      mxu_dtype: dtype for the matmul operands; default bf16 iff x is bf16.
    Returns:
      (B, H*W//4, 2C), dtype of x.
    """
    H, W = input_resolution
    B, L, C = x.shape
    assert L == H * W, "input feature has wrong size"
    assert H % 2 == 0 and W % 2 == 0, f"x size ({H}*{W}) are not even."
    assert gamma.shape == (4 * C,) and beta.shape == (4 * C,)
    assert w_red.shape == (4 * C, 2 * C)

    Wh = W // 2
    num_rp = B * (H // 2)          # image row-pairs
    rows = num_rp * Wh             # merged output rows
    C2, C4 = 2 * C, 4 * C
    C2p = -(-C2 // 128) * 128      # lane-dense output width
    out_dtype = x.dtype
    if mxu_dtype is None:
        mxu_dtype = jnp.bfloat16 if x.dtype == jnp.bfloat16 else jnp.float32

    # In-kernel concat order is [x0 | x2 | x1 | x3] (even-row block spans col
    # parities 0,1 then odd-row block).  Permute the PARAMETERS to torch's
    # [x0 | x1 | x2 | x3] order; LN mean/var are permutation invariant.
    perm = jnp.concatenate([jnp.arange(0, C), jnp.arange(2 * C, 3 * C),
                            jnp.arange(C, 2 * C), jnp.arange(3 * C, 4 * C)])
    w32 = w_red.astype(jnp.float32)
    w_fold = (gamma.astype(jnp.float32)[:, None] * w32)[perm, :]    # (4C, 2C)
    bias = (beta.astype(jnp.float32) @ w32).reshape(1, C2)          # (1, 2C)
    if C2p != C2:
        w_fold = jnp.pad(w_fold, ((0, 0), (0, C2p - C2)))
        bias = jnp.pad(bias, ((0, 0), (0, C2p - C2)))
    w_fold = w_fold.astype(mxu_dtype)
    bias = bias.astype(jnp.float32)

    # Free (contiguous) reshape: (B, H*W, C) -> (B*H/2, 2, W/2, 2C).
    xv = x.reshape(num_rp, 2, Wh, C2)

    in_item = x.dtype.itemsize
    out_item = jnp.dtype(out_dtype).itemsize
    in_rp_bytes = 2 * W * C * in_item
    out_rp_bytes = Wh * C2p * out_item
    row_align = max(8, 32 // out_item)             # 8 for f32, 16 for bf16
    tr = _choose_tr(num_rp, Wh, in_rp_bytes, out_rp_bytes, row_align,
                    target_rows, vmem_budget)
    grid = num_rp // tr

    # VMEM estimate: double-buffered in/out blocks, (invariant but still
    # double-buffered) weight + bias, f32 intermediates inside the kernel.
    # TODO(synk): single-buffer the invariant weight/bias once
    # pipeline_mode=pl.Buffered(1) is reliably available.
    w_bytes = C4 * C2p * jnp.dtype(mxu_dtype).itemsize
    interm = tr * Wh * (2 * C4 * 4 + C2p * 4)
    need = (2 * tr * in_rp_bytes + 2 * tr * out_rp_bytes
            + 2 * (w_bytes + C2p * 4) + interm)
    vmem_limit = int(min(64 * 2 ** 20, max(32 * 2 ** 20, need * 3 // 2)))

    out = pl.pallas_call(
        _patch_merge_kernel,
        out_shape=jax.ShapeDtypeStruct((rows, C2p), out_dtype),
        grid_spec=pltpu.PrefetchScalarGridSpec(
            num_scalar_prefetch=0,
            grid=(grid,),
            in_specs=[
                pl.BlockSpec((tr, 2, Wh, C2), lambda i: (i, 0, 0, 0)),  # x rows
                pl.BlockSpec((C4, C2p), lambda i: (0, 0)),              # weight
                pl.BlockSpec((1, C2p), lambda i: (0, 0)),               # bias
            ],
            out_specs=pl.BlockSpec((tr * Wh, C2p), lambda i: (i, 0)),
        ),
        compiler_params=pltpu.CompilerParams(
            dimension_semantics=("parallel",),
            vmem_limit_bytes=vmem_limit),
        cost_estimate=pl.CostEstimate(
            flops=2 * rows * C4 * C2p,
            transcendentals=rows,
            bytes_accessed=rows * (C4 * in_item + C2p * out_item) + w_bytes),
    )(xv, w_fold, bias)

    if C2p != C2:
        out = out[:, :C2]
    return out.reshape(B, (H // 2) * (W // 2), C2)


def patch_merging_ref(x, gamma, beta, w_red, input_resolution):
    """Pure-JAX reference matching the PyTorch module semantics."""
    H, W = input_resolution
    B, L, C = x.shape
    xv = x.reshape(B, H, W, C).astype(jnp.float32)
    x0 = xv[:, 0::2, 0::2, :]
    x1 = xv[:, 1::2, 0::2, :]
    x2 = xv[:, 0::2, 1::2, :]
    x3 = xv[:, 1::2, 1::2, :]
    xm = jnp.concatenate([x0, x1, x2, x3], axis=-1).reshape(B, -1, 4 * C)
    mean = jnp.mean(xm, axis=-1, keepdims=True)
    var = jnp.mean((xm - mean) ** 2, axis=-1, keepdims=True)
    xn = (xm - mean) / jnp.sqrt(var + EPS)
    y = xn * gamma + beta
    return y @ w_red


if __name__ == "__main__":
    # Small shapes consistent with the module: dim=C=32, resolution 16x16, B=2.
    B, H, W, C = 2, 16, 16, 32
    key = jax.random.PRNGKey(0)
    kx, kw, kg, kb = jax.random.split(key, 4)

    x = jax.random.normal(kx, (B, H * W, C), dtype=jnp.float32)
    gamma = 1.0 + 0.1 * jax.random.normal(kg, (4 * C,), dtype=jnp.float32)
    beta = 0.1 * jax.random.normal(kb, (4 * C,), dtype=jnp.float32)
    # torch weight shape is (2C, 4C); store transposed so the math is y @ w.
    w_red = (jax.random.normal(kw, (4 * C, 2 * C), dtype=jnp.float32)
             / jnp.sqrt(4.0 * C))

    # f32 path (f32 MXU operands) -- tight check against the reference.
    out = patch_merging_pallas(x, gamma, beta, w_red, (H, W))
    out = jax.block_until_ready(out)
    ref = patch_merging_ref(x, gamma, beta, w_red, (H, W))
    assert out.shape == (B, (H // 2) * (W // 2), 2 * C), out.shape
    err = float(jnp.max(jnp.abs(out - ref)))
    assert err < 5e-4, f"f32 path max err {err}"

    # bf16 activations -> bf16 MXU operands with f32 accumulation (loose check).
    xb = x.astype(jnp.bfloat16)
    outb = patch_merging_pallas(xb, gamma, beta, w_red, (H, W))
    outb = jax.block_until_ready(outb)
    refb = patch_merging_ref(xb.astype(jnp.float32), gamma, beta, w_red, (H, W))
    assert outb.shape == (B, (H // 2) * (W // 2), 2 * C), outb.shape
    errb = float(jnp.max(jnp.abs(outb.astype(jnp.float32) - refb)))
    assert errb < 0.25, f"bf16 path max err {errb}"

    print("KERNEL_OK")
</pallas_src>

<mosaic_0001>
module attributes {stable_mosaic.version = 11 : i64} {
  func.func @_patch_merge_kernel(%arg0: i32, %arg1: memref<16x2x8x64xf32, #tpu.memory_space<vmem>>, %arg2: memref<128x128xf32, #tpu.memory_space<vmem>>, %arg3: memref<1x128xf32, #tpu.memory_space<vmem>>, %arg4: memref<128x128xf32, #tpu.memory_space<vmem>>) attributes {dimension_semantics = [#tpu.dimension_semantics<parallel>], iteration_bounds = array<i64: 1>, scalar_prefetch = 0 : i64, scratch_operands = 0 : i64, tpu.core_type = #tpu.core_type<tc>, window_params = [{transform_indices = @transform_0, window_bounds = array<i64: 16, 2, 8, 64>}, {pipeline_mode = #tpu.pipeline_mode<synchronous>, transform_indices = @transform_1, window_bounds = array<i64: 128, 128>}, {pipeline_mode = #tpu.pipeline_mode<synchronous>, transform_indices = @transform_2, window_bounds = array<i64: 1, 128>}, {transform_indices = @transform_3, window_bounds = array<i64: 128, 128>}]} {
    %c0 = arith.constant 0 : index
    %c0_0 = arith.constant 0 : index
    %c0_1 = arith.constant 0 : index
    %c0_2 = arith.constant 0 : index
    %0 = vector.load %arg1[%c0, %c0_0, %c0_1, %c0_2] : memref<16x2x8x64xf32, #tpu.memory_space<vmem>>, vector<16x2x8x64xf32>
    %1 = vector.extract_strided_slice %0 {offsets = [0, 0, 0, 0], sizes = [16, 1, 8, 64], strides = [1, 1, 1, 1]} : vector<16x2x8x64xf32> to vector<16x1x8x64xf32>
    %2 = vector.shape_cast %1 : vector<16x1x8x64xf32> to vector<16x8x64xf32>
    %3 = vector.extract_strided_slice %0 {offsets = [0, 1, 0, 0], sizes = [16, 1, 8, 64], strides = [1, 1, 1, 1]} : vector<16x2x8x64xf32> to vector<16x1x8x64xf32>
    %4 = vector.shape_cast %3 : vector<16x1x8x64xf32> to vector<16x8x64xf32>
    %5 = tpu.concatenate %2, %4 in 2 : vector<16x8x64xf32>, vector<16x8x64xf32> -> vector<16x8x128xf32>
    %6 = vector.shape_cast %5 : vector<16x8x128xf32> to vector<128x128xf32>
    %cst = arith.constant dense<0.000000e+00> : vector<128xf32>
    %7 = vector.multi_reduction <add>, %6, %cst [1] : vector<128x128xf32> to vector<128xf32>
    %8 = vector.shape_cast %7 : vector<128xf32> to vector<128x1xf32>
    %cst_3 = arith.constant 1.280000e+02 : f32
    %9 = vector.broadcast %cst_3 : f32 to vector<128x1xf32>
    %10 = arith.divf %8, %9 : vector<128x1xf32>
    %11 = vector.broadcast %10 : vector<128x1xf32> to vector<128x128xf32>
    %12 = arith.subf %6, %11 : vector<128x128xf32>
    %13 = arith.mulf %12, %12 : vector<128x128xf32>
    %cst_4 = arith.constant dense<0.000000e+00> : vector<128xf32>
    %14 = vector.multi_reduction <add>, %13, %cst_4 [1] : vector<128x128xf32> to vector<128xf32>
    %15 = vector.shape_cast %14 : vector<128xf32> to vector<128x1xf32>
    %cst_5 = arith.constant 1.280000e+02 : f32
    %16 = vector.broadcast %cst_5 : f32 to vector<128x1xf32>
    %17 = arith.divf %15, %16 : vector<128x1xf32>
    %cst_6 = arith.constant 9.99999974E-6 : f32
    %18 = vector.broadcast %cst_6 : f32 to vector<128x1xf32>
    %19 = arith.addf %17, %18 : vector<128x1xf32>
    %20 = math.rsqrt %19 : vector<128x1xf32>
    %21 = vector.broadcast %20 : vector<128x1xf32> to vector<128x128xf32>
    %22 = arith.mulf %12, %21 : vector<128x128xf32>
    %c0_7 = arith.constant 0 : index
    %c0_8 = arith.constant 0 : index
    %23 = vector.load %arg2[%c0_7, %c0_8] : memref<128x128xf32, #tpu.memory_space<vmem>>, vector<128x128xf32>
    %cst_9 = arith.constant dense<0.000000e+00> : vector<128x128xf32>
    %24 = tpu.matmul %22, %23, %cst_9 {dimension_numbers = #tpu.dot_dimension_numbers<[1], [0], [0], [1], [0, 0, 1, 1], [], []>} : vector<128x128xf32>, vector<128x128xf32>, vector<128x128xf32> -> vector<128x128xf32>
    %c0_10 = arith.constant 0 : index
    %c0_11 = arith.constant 0 : index
    %25 = vector.load %arg3[%c0_10, %c0_11] : memref<1x128xf32, #tpu.memory_space<vmem>>, vector<1x128xf32>
    %26 = vector.broadcast %25 : vector<1x128xf32> to vector<128x128xf32>
    %27 = arith.addf %24, %26 : vector<128x128xf32>
    %c0_12 = arith.constant 0 : index
    %c0_13 = arith.constant 0 : index
    %28 = vector.load %arg4[%c0_12, %c0_13] : memref<128x128xf32, #tpu.memory_space<vmem>>, vector<128x128xf32>
    tpu.vector_store %arg4[%c0_12, %c0_13], %27 {strides = array<i32>} : memref<128x128xf32, #tpu.memory_space<vmem>>, vector<128x128xf32>,
    return
  }
  func.func @transform_0(%arg0: i32) -> (i32, i32, i32, i32) {
    %c0_i32 = arith.constant 0 : i32
    %c0_i32_0 = arith.constant 0 : i32
    %c0_i32_1 = arith.constant 0 : i32
    %c0_i32_2 = arith.constant 0 : i32
    return %arg0, %c0_i32, %c0_i32_0, %c0_i32_1 : i32, i32, i32, i32
  }
  func.func @transform_1(%arg0: i32) -> (i32, i32) {
    %c0_i32 = arith.constant 0 : i32
    %c0_i32_0 = arith.constant 0 : i32
    %c0_i32_1 = arith.constant 0 : i32
    return %c0_i32, %c0_i32_0 : i32, i32
  }
  func.func @transform_2(%arg0: i32) -> (i32, i32) {
    %c0_i32 = arith.constant 0 : i32
    %c0_i32_0 = arith.constant 0 : i32
    %c0_i32_1 = arith.constant 0 : i32
    return %c0_i32, %c0_i32_0 : i32, i32
  }
  func.func @transform_3(%arg0: i32) -> (i32, i32) {
    %c0_i32 = arith.constant 0 : i32
    %c0_i32_0 = arith.constant 0 : i32
    return %arg0, %c0_i32 : i32, i32
  }
}

</mosaic_0001>

<bundles_post_ra>
// kernel: tpu_custom_call.1
= control target key start
LH: loop header
LB: loop body
LE: loop exit
PB: predicated region body
PF: predicated region fallthrough
CT: control target
= control target key end

     0   :  { %8 = vsyncpa [#allocation3], 0  ;;  %s967_s0 = inlined_call_operand.hbm [shape: f32[16,2,8,64], index: 0, kind: input, shape index: {}]   ;;  %s968_s1 = inlined_call_operand.hbm [shape: f32[128,128], index: 1, kind: input, shape index: {}]   ;;  %s969_s2 = inlined_call_operand.vmem [shape: f32[1,128], index: 2, kind: input, shape index: {}]   ;;  %s970_s3 = inlined_call_operand.hbm [shape: f32[128,128], index: 3, kind: output, shape index: {}]  }
   0x1   :  { %9 = vsyncpa [#allocation6], 0 }
   0x2   :  { %10 = vsyncpa [#allocation4], 0  ;;  %s760_s12 = smov [#allocation2]  }
   0x3   :  { %s16_s13 = sshll.u32 %s760_s12, 4  ;;  %s17_s13 = int_to_ptr.vmem [resolvable:$true] %s16_s13 }
   0x4   :  { %s702_s14 = scalar_lea.vmem %s17_s13, 4096  ;;  %p707_p1 = scmp.lt.s32.totalorder %s17_s13, %s17_s13 }
   0x5   :  { %p703_p0 = scmp.ne.s32.totalorder %s17_s13, %s702_s14  ;;  %p708_p2 = scmp.lt.s32.totalorder %s702_s14, %s702_s14 }
   0x7   :  { %p709_p3 = por %p708_p2, %p707_p1 }
   0x9   :  { %p710_p4 = pnand %p709_p3, %p703_p0 }
   0xb   :  { %713 = shalt.err (!%p710_p4)
}
   0xc   :  { %s761_s15 = smov 128   ;;  %s762_s16 = smov 8  }
   0xd   :  { %22 = dma.hbm_to_vmem [thread:$0]  %s967_s0, 4096, %s17_s13, [#allocation3], %s761_s15, %s761_s15, %s762_s16  }
   0xe   :  { %s763_s19 = smov [#allocation5]  }
   0xf   :  { %s28_s20 = sshll.u32 %s763_s19, 4  ;;  %s29_s20 = int_to_ptr.vmem [resolvable:$true] %s28_s20 }
  0x10   :  { %s722_s21 = scalar_lea.vmem %s29_s20, 2048  ;;  %p727_p6 = scmp.lt.s32.totalorder %s29_s20, %s29_s20 }
  0x11   :  { %p723_p5 = scmp.ne.s32.totalorder %s29_s20, %s722_s21  ;;  %p728_p7 = scmp.lt.s32.totalorder %s722_s21, %s722_s21 }
  0x13   :  { %p729_p8 = por %p728_p7, %p727_p6 }
  0x15   :  { %p730_p9 = pnand %p729_p8, %p723_p5 }
  0x17   :  { %733 = shalt.err (!%p730_p9)
}
  0x18   :  { %34 = dma.hbm_to_vmem [thread:$0]  %s968_s1, 2048, %s29_s20, [#allocation6], %s761_s15, %s761_s15, %s762_s16  }
  0x19   :  { %754 = dma.done.wait [#allocation3], 4096  }
  0x1a   :  { %755 = vsyncadd [#allocation3], 4294963200 }
  0x1b   :  { %756 = dma.done.wait [#allocation6], 2048  }
  0x1c   :  { %757 = vsyncadd [#allocation6], 4294965248  ;;  %v44_v0 = vld [vmem:[#allocation2 + $0x8] sm:$0xff]  ;;  %v46_v1 = vld [vmem:[#allocation2 + $0x18] sm:$0xff]  ;;  %s764_s0 = smov 64   ;;  %vm139_vm0 = vcmask 523264  }
  0x1d   :  { %91 = vrot.lane.b32.xlu0 %v44_v0, %s764_s0  ;;  %93 = vrot.lane.b32.xlu1 %v46_v1, %s764_s0  ;;  %v60_v2 = vld [vmem:[#allocation2 + $0x88] sm:$0xff]  ;;  %v62_v3 = vld [vmem:[#allocation2 + $0x98] sm:$0xff]  ;;  %v43_v16 = vld [vmem:[#allocation2] sm:$0xff] }
  0x1e   :  { %v48_v4 = vld [vmem:[#allocation2 + $0x28] sm:$0xff]  ;;  %v50_v6 = vld [vmem:[#allocation2 + $0x38] sm:$0xff]  ;;  %v45_v19 = vld [vmem:[#allocation2 + $0x10] sm:$0xff] }
  0x1f   :  { %v64_v5 = vld [vmem:[#allocation2 + $0xa8] sm:$0xff]  ;;  %v66_v7 = vld [vmem:[#allocation2 + $0xb8] sm:$0xff]  ;;  %v59_v21 = vld [vmem:[#allocation2 + $0x80] sm:$0xff] }
  0x20   :  { %v52_v8 = vld [vmem:[#allocation2 + $0x48] sm:$0xff]  ;;  %v54_v10 = vld [vmem:[#allocation2 + $0x58] sm:$0xff]  ;;  %v61_v25 = vld [vmem:[#allocation2 + $0x90] sm:$0xff] }
  0x21   :  { %107 = vrot.lane.b32.xlu0 %v60_v2, %s764_s0  ;;  %109 = vrot.lane.b32.xlu1 %v62_v3, %s764_s0  ;;  %v68_v9 = vld [vmem:[#allocation2 + $0xc8] sm:$0xff]  ;;  %v70_v11 = vld [vmem:[#allocation2 + $0xd8] sm:$0xff]  ;;  %v47_v27 = vld [vmem:[#allocation2 + $0x20] sm:$0xff] }
  0x22   :  { %v56_v12 = vld [vmem:[#allocation2 + $0x68] sm:$0xff]  ;;  %v58_v14 = vld [vmem:[#allocation2 + $0x78] sm:$0xff]  ;;  %v63_v31 = vld [vmem:[#allocation2 + $0xa0] sm:$0xff] }
  0x23   :  { %v72_v13 = vld [vmem:[#allocation2 + $0xe8] sm:$0xff]  ;;  %v74_v15 = vld [vmem:[#allocation2 + $0xf8] sm:$0xff]  ;;  %v49_v33 = vld [vmem:[#allocation2 + $0x30] sm:$0xff] }
  0x24   :  { %v65_v37 = vld [vmem:[#allocation2 + $0xb0] sm:$0xff]  ;;  %v51_v39 = vld [vmem:[#allocation2 + $0x40] sm:$0xff]  ;;  %v348_v0 = vld [vmem:[#allocation5 + $0x78] sm:$0xff] }
  0x25   :  { %95 = vrot.lane.b32.xlu0 %v48_v4, %s764_s0  ;;  %111 = vrot.lane.b32.xlu1 %v64_v5, %s764_s0  ;;  %v67_v43 = vld [vmem:[#allocation2 + $0xc0] sm:$0xff]  ;;  %v53_v45 = vld [vmem:[#allocation2 + $0x50] sm:$0xff]  ;;  %v346_v2 = vld [vmem:[#allocation5 + $0x68] sm:$0xff] }
  0x26   :  { %v69_v49 = vld [vmem:[#allocation2 + $0xd0] sm:$0xff]  ;;  %v55_v51 = vld [vmem:[#allocation2 + $0x60] sm:$0xff]  ;;  %568 = vmatprep.subr.mxu0 %v348_v0  ;;  %624 = vmatprep.subr.mxu1 %v348_v0 }
  0x27   :  { %v71_v55 = vld [vmem:[#allocation2 + $0xe0] sm:$0xff]  ;;  %v57_v57 = vld [vmem:[#allocation2 + $0x70] sm:$0xff]  ;;  %569 = vmatpush3.msra.mxu0 %v348_v0  ;;  %640 = vmatpush3.msra.mxu1 %v348_v0 }
  0x28   :  { %v73_v61 = vld [vmem:[#allocation2 + $0xf0] sm:$0xff]  ;;  %v345_v3 = vld [vmem:[#allocation5 + $0x60] sm:$0xff] }
  0x29   :  { %97 = vrot.lane.b32.xlu0 %v50_v6, %s764_s0  ;;  %113 = vrot.lane.b32.xlu1 %v66_v7, %s764_s0  ;;  %v347_v1 = vld [vmem:[#allocation5 + $0x70] sm:$0xff] }
  0x2a   :  { %570 = vmatprep.subr.mxu0 %v347_v1  ;;  %625 = vmatprep.subr.mxu1 %v347_v1  ;;  %v339_v0 = vld [vmem:[#allocation5 + $0x30] sm:$0xff] }
  0x2b   :  { %571 = vmatpush3.msra.mxu0 %v347_v1  ;;  %641 = vmatpush3.msra.mxu1 %v347_v1 }
  0x2c   :  { %572 = vmatprep.subr.mxu0 %v346_v2  ;;  %626 = vmatprep.subr.mxu1 %v346_v2 }
  0x2d   :  { %99 = vrot.lane.b32.xlu0 %v52_v8, %s764_s0  ;;  %115 = vrot.lane.b32.xlu1 %v68_v9, %s764_s0 }
  0x2e   :  { %573 = vmatpush3.msra.mxu0 %v346_v2  ;;  %642 = vmatpush3.msra.mxu1 %v346_v2 }
  0x2f   :  { %574 = vmatprep.subr.mxu0 %v345_v3  ;;  %627 = vmatprep.subr.mxu1 %v345_v3 }
  0x30   :  { %575 = vmatpush3.msra.mxu0 %v345_v3  ;;  %643 = vmatpush3.msra.mxu1 %v345_v3 }
  0x31   :  { %101 = vrot.lane.b32.xlu0 %v54_v10, %s764_s0  ;;  %117 = vrot.lane.b32.xlu1 %v70_v11, %s764_s0 }
  0x35   :  { %103 = vrot.lane.b32.xlu0 %v56_v12, %s764_s0  ;;  %119 = vrot.lane.b32.xlu1 %v72_v13, %s764_s0 }
  0x39   :  { %105 = vrot.lane.b32.xlu0 %v58_v14, %s764_s0  ;;  %121 = vrot.lane.b32.xlu1 %v74_v15, %s764_s0 }
  0x8f   :  { %v92_v17 = vpop.permute.xlu0 %91  ;;  %v94_v18 = vpop.permute.xlu1 %93 }
  0x90   :  { %v799_v20 = vsel %vm139_vm0, %v43_v16, %v92_v17  ;;  %v803_v22 = vsel %vm139_vm0, %v45_v19, %v94_v18 }
  0x91   :  { %156 = vadd.xlane.f32.xlu0 %v799_v20 }
  0x93   :  { %v108_v23 = vpop.permute.xlu0 %107  ;;  %v110_v24 = vpop.permute.xlu1 %109 }
  0x94   :  { %v806_v26 = vsel %vm139_vm0, %v59_v21, %v108_v23  ;;  %v811_v28 = vsel %vm139_vm0, %v61_v25, %v110_v24 }
  0x95   :  { %172 = vadd.xlane.f32.xlu1 %v806_v26  ;;  %158 = vadd.xlane.f32.xlu0 %v803_v22 }
  0x97   :  { %v96_v29 = vpop.permute.xlu0 %95  ;;  %v112_v30 = vpop.permute.xlu1 %111 }
  0x98   :  { %v814_v32 = vsel %vm139_vm0, %v47_v27, %v96_v29  ;;  %v819_v34 = vsel %vm139_vm0, %v63_v31, %v112_v30 }
  0x99   :  { %160 = vadd.xlane.f32.xlu1 %v814_v32  ;;  %174 = vadd.xlane.f32.xlu0 %v811_v28 }
  0x9b   :  { %v98_v35 = vpop.permute.xlu0 %97  ;;  %v114_v36 = vpop.permute.xlu1 %113 }
  0x9c   :  { %v822_v38 = vsel %vm139_vm0, %v49_v33, %v98_v35  ;;  %v827_v40 = vsel %vm139_vm0, %v65_v37, %v114_v36 }
  0x9d   :  { %162 = vadd.xlane.f32.xlu1 %v822_v38  ;;  %176 = vadd.xlane.f32.xlu0 %v819_v34 }
  0x9f   :  { %v100_v41 = vpop.permute.xlu0 %99  ;;  %v116_v42 = vpop.permute.xlu1 %115 }
  0xa0   :  { %v830_v44 = vsel %vm139_vm0, %v51_v39, %v100_v41  ;;  %v835_v46 = vsel %vm139_vm0, %v67_v43, %v116_v42 }
  0xa1   :  { %164 = vadd.xlane.f32.xlu1 %v830_v44  ;;  %178 = vadd.xlane.f32.xlu0 %v827_v40 }
  0xa3   :  { %v102_v47 = vpop.permute.xlu0 %101  ;;  %v118_v48 = vpop.permute.xlu1 %117 }
  0xa4   :  { %v838_v50 = vsel %vm139_vm0, %v53_v45, %v102_v47  ;;  %v843_v52 = vsel %vm139_vm0, %v69_v49, %v118_v48 }
  0xa5   :  { %166 = vadd.xlane.f32.xlu1 %v838_v50  ;;  %180 = vadd.xlane.f32.xlu0 %v835_v46 }
  0xa7   :  { %v104_v53 = vpop.permute.xlu0 %103  ;;  %v120_v54 = vpop.permute.xlu1 %119 }
  0xa8   :  { %v846_v56 = vsel %vm139_vm0, %v55_v51, %v104_v53  ;;  %v851_v58 = vsel %vm139_vm0, %v71_v55, %v120_v54  ;;  %v341_v51 = vld [vmem:[#allocation5 + $0x40] sm:$0xff] }
  0xa9   :  { %168 = vadd.xlane.f32.xlu1 %v846_v56  ;;  %182 = vadd.xlane.f32.xlu0 %v843_v52 }
  0xab   :  { %v106_v59 = vpop.permute.xlu0 %105  ;;  %v122_v60 = vpop.permute.xlu1 %121 }
  0xac   :  { %v854_v62 = vsel %vm139_vm0, %v57_v57, %v106_v59  ;;  %v859_v63 = vsel %vm139_vm0, %v73_v61, %v122_v60 }
  0xad   :  { %170 = vadd.xlane.f32.xlu1 %v854_v62  ;;  %184 = vadd.xlane.f32.xlu0 %v851_v58 }
  0xb1   :  { %186 = vadd.xlane.f32.xlu0 %v859_v63 }
 0x11a   :  { %v157_v4 = vpop.xlane.xlu0 %156 }
 0x11b   :  { %v189_v5 = vmul.f32 0.0078125, %v157_v4 }
 0x11d   :  { %v863_v6 = vsub.f32 %v799_v20, %v189_v5 }
 0x11e   :  { %v173_v7 = vpop.xlane.xlu1 %172  ;;  %v159_v8 = vpop.xlane.xlu0 %158 }
 0x11f   :  { %v197_v9 = vmul.f32 0.0078125, %v173_v7  ;;  %v190_v10 = vmul.f32 0.0078125, %v159_v8  ;;  %v221_v11 = vmul.f32 %v863_v6, %v863_v6 }
 0x121   :  { %v868_v12 = vsub.f32 %v806_v26, %v197_v9  ;;  %v871_v13 = vsub.f32 %v803_v22, %v190_v10  ;;  %237 = vadd.xlane.f32.xlu1 %v221_v11 }
 0x122   :  { %v161_v14 = vpop.xlane.xlu1 %160  ;;  %v175_v15 = vpop.xlane.xlu0 %174 }
 0x123   :  { %v191_v16 = vmul.f32 0.0078125, %v161_v14  ;;  %v198_v17 = vmul.f32 0.0078125, %v175_v15  ;;  %v229_v18 = vmul.f32 %v868_v12, %v868_v12  ;;  %v222_v19 = vmul.f32 %v871_v13, %v871_v13  ;;  %v337_v15 = vld [vmem:[#allocation5 + $0x20] sm:$0xff] }
 0x125   :  { %v878_v20 = vsub.f32 %v814_v32, %v191_v16  ;;  %v881_v21 = vsub.f32 %v811_v28, %v198_v17  ;;  %253 = vadd.xlane.f32.xlu0 %v229_v18  ;;  %239 = vadd.xlane.f32.xlu1 %v222_v19  ;;  %v344_v32 = vld [vmem:[#allocation5 + $0x58] sm:$0xff]  ;;  %v335_v17 = vld [vmem:[#allocation5 + $0x10] sm:$0xff]  ;;  %v334_v18 = vld [vmem:[#allocation5 + $0x8] sm:$0xff] }
 0x126   :  { %v163_v22 = vpop.xlane.xlu1 %162  ;;  %v177_v23 = vpop.xlane.xlu0 %176  ;;  %576 = vmatprep.subr.mxu0 %v344_v32  ;;  %628 = vmatprep.subr.mxu1 %v344_v32 }
 0x127   :  { %v192_v24 = vmul.f32 0.0078125, %v163_v22  ;;  %v199_v25 = vmul.f32 0.0078125, %v177_v23  ;;  %v223_v26 = vmul.f32 %v878_v20, %v878_v20  ;;  %v230_v27 = vmul.f32 %v881_v21, %v881_v21  ;;  %577 = vmatpush3.msra.mxu0 %v344_v32  ;;  %644 = vmatpush3.msra.mxu1 %v344_v32 }
 0x129   :  { %v888_v29 = vsub.f32 %v822_v38, %v192_v24  ;;  %v891_v30 = vsub.f32 %v819_v34, %v199_v25  ;;  %241 = vadd.xlane.f32.xlu1 %v223_v26  ;;  %255 = vadd.xlane.f32.xlu0 %v230_v27  ;;  %v343_v38 = vld [vmem:[#allocation5 + $0x50] sm:$0xff] }
 0x12a   :  { %v165_v28 = vpop.xlane.xlu1 %164  ;;  %v179_v31 = vpop.xlane.xlu0 %178  ;;  %578 = vmatprep.subr.mxu0 %v343_v38  ;;  %629 = vmatprep.subr.mxu1 %v343_v38 }
 0x12b   :  { %v193_v33 = vmul.f32 0.0078125, %v165_v28  ;;  %v200_v35 = vmul.f32 0.0078125, %v179_v31  ;;  %v224_v36 = vmul.f32 %v888_v29, %v888_v29  ;;  %v231_v37 = vmul.f32 %v891_v30, %v891_v30  ;;  %579 = vmatpush3.msra.mxu0 %v343_v38  ;;  %645 = vmatpush3.msra.mxu1 %v343_v38 }
 0x12d   :  { %v898_v34 = vsub.f32 %v830_v44, %v193_v33  ;;  %v901_v39 = vsub.f32 %v827_v40, %v200_v35  ;;  %243 = vadd.xlane.f32.xlu1 %v224_v36  ;;  %257 = vadd.xlane.f32.xlu0 %v231_v37  ;;  %v342_v44 = vld [vmem:[#allocation5 + $0x48] sm:$0xff] }
 0x12e   :  { %v167_v41 = vpop.xlane.xlu1 %166  ;;  %v181_v42 = vpop.xlane.xlu0 %180  ;;  %580 = vmatprep.subr.mxu0 %v342_v44  ;;  %630 = vmatprep.subr.mxu1 %v342_v44 }
 0x12f   :  { %v194_v43 = vmul.f32 0.0078125, %v167_v41  ;;  %v201_v45 = vmul.f32 0.0078125, %v181_v42  ;;  %v225_v47 = vmul.f32 %v898_v34, %v898_v34  ;;  %v232_v48 = vmul.f32 %v901_v39, %v901_v39  ;;  %581 = vmatpush3.msra.mxu0 %v342_v44  ;;  %646 = vmatpush3.msra.mxu1 %v342_v44 }
 0x130   :  { %582 = vmatprep.subr.mxu0 %v341_v51  ;;  %631 = vmatprep.subr.mxu1 %v341_v51 }
 0x131   :  { %v908_v40 = vsub.f32 %v838_v50, %v194_v43  ;;  %v911_v49 = vsub.f32 %v835_v46, %v201_v45  ;;  %245 = vadd.xlane.f32.xlu1 %v225_v47  ;;  %259 = vadd.xlane.f32.xlu0 %v232_v48  ;;  %v340_v50 = vld [vmem:[#allocation5 + $0x38] sm:$0xff] }
 0x132   :  { %v169_v53 = vpop.xlane.xlu1 %168  ;;  %v183_v54 = vpop.xlane.xlu0 %182  ;;  %583 = vmatpush3.msra.mxu0 %v341_v51  ;;  %647 = vmatpush3.msra.mxu1 %v341_v51 }
 0x133   :  { %v195_v55 = vmul.f32 0.0078125, %v169_v53  ;;  %v202_v57 = vmul.f32 0.0078125, %v183_v54  ;;  %v226_v59 = vmul.f32 %v908_v40, %v908_v40  ;;  %v233_v60 = vmul.f32 %v911_v49, %v911_v49  ;;  %584 = vmatprep.subr.mxu0 %v340_v50  ;;  %632 = vmatprep.subr.mxu1 %v340_v50 }
 0x134   :  { %585 = vmatpush3.msra.mxu0 %v340_v50  ;;  %648 = vmatpush3.msra.mxu1 %v340_v50 }
 0x135   :  { %v918_v46 = vsub.f32 %v846_v56, %v195_v55  ;;  %v921_v61 = vsub.f32 %v843_v52, %v202_v57  ;;  %247 = vadd.xlane.f32.xlu1 %v226_v59  ;;  %261 = vadd.xlane.f32.xlu0 %v233_v60  ;;  %v338_v52 = vld [vmem:[#allocation5 + $0x28] sm:$0xff] }
 0x136   :  { %v171_v1 = vpop.xlane.xlu1 %170  ;;  %v185_v2 = vpop.xlane.xlu0 %184  ;;  %586 = vmatprep.subr.mxu0 %v339_v0  ;;  %633 = vmatprep.subr.mxu1 %v339_v0 }
 0x137   :  { %v196_v3 = vmul.f32 0.0078125, %v171_v1  ;;  %v203_v4 = vmul.f32 0.0078125, %v185_v2  ;;  %v227_v5 = vmul.f32 %v918_v46, %v918_v46  ;;  %v234_v7 = vmul.f32 %v921_v61, %v921_v61  ;;  %587 = vmatpush3.msra.mxu0 %v339_v0  ;;  %649 = vmatpush3.msra.mxu1 %v339_v0 }
 0x138   :  { %588 = vmatprep.subr.mxu0 %v338_v52  ;;  %634 = vmatprep.subr.mxu1 %v338_v52 }
 0x139   :  { %v928_v56 = vsub.f32 %v854_v62, %v196_v3  ;;  %v931_v8 = vsub.f32 %v851_v58, %v203_v4  ;;  %249 = vadd.xlane.f32.xlu1 %v227_v5  ;;  %263 = vadd.xlane.f32.xlu0 %v234_v7  ;;  %v336_v62 = vld [vmem:[#allocation5 + $0x18] sm:$0xff] }
 0x13a   :  { %v187_v9 = vpop.xlane.xlu0 %186  ;;  %589 = vmatpush3.msra.mxu0 %v338_v52  ;;  %650 = vmatpush3.msra.mxu1 %v338_v52 }
 0x13b   :  { %v204_v10 = vmul.f32 0.0078125, %v187_v9  ;;  %v228_v11 = vmul.f32 %v928_v56, %v928_v56  ;;  %v235_v14 = vmul.f32 %v931_v8, %v931_v8  ;;  %590 = vmatprep.subr.mxu0 %v337_v15  ;;  %635 = vmatprep.subr.mxu1 %v337_v15 }
 0x13c   :  { %591 = vmatpush3.msra.mxu0 %v337_v15  ;;  %651 = vmatpush3.msra.mxu1 %v337_v15 }
 0x13d   :  { %v938_v58 = vsub.f32 %v859_v63, %v204_v10  ;;  %251 = vadd.xlane.f32.xlu1 %v228_v11  ;;  %265 = vadd.xlane.f32.xlu0 %v235_v14  ;;  %v333_v63 = vld [vmem:[#allocation5] sm:$0xff] }
 0x13e   :  { %592 = vmatprep.subr.mxu0 %v336_v62  ;;  %636 = vmatprep.subr.mxu1 %v336_v62 }
 0x13f   :  { %v236_v16 = vmul.f32 %v938_v58, %v938_v58  ;;  %593 = vmatpush3.msra.mxu0 %v336_v62  ;;  %652 = vmatpush3.msra.mxu1 %v336_v62 }
 0x140   :  { %594 = vmatprep.subr.mxu0 %v335_v17  ;;  %637 = vmatprep.subr.mxu1 %v335_v17 }
 0x141   :  { %267 = vadd.xlane.f32.xlu0 %v236_v16  ;;  %595 = vmatpush3.msra.mxu0 %v335_v17 }
 0x142   :  { %596 = vmatprep.subr.mxu0 %v334_v18  ;;  %653 = vmatpush3.msra.mxu1 %v335_v17 }
 0x143   :  { %597 = vmatpush3.msra.mxu0 %v334_v18  ;;  %638 = vmatprep.subr.mxu1 %v334_v18 }
 0x144   :  { %598 = vmatprep.subr.mxu0 %v333_v63  ;;  %654 = vmatpush3.msra.mxu1 %v334_v18 }
 0x145   :  { %599 = vmatpush3.msra.mxu0 %v333_v63  ;;  %639 = vmatprep.subr.mxu1 %v333_v63 }
 0x146   :  { %655 = vmatpush3.msra.mxu1 %v333_v63 }
 0x1aa   :  { %v238_v19 = vpop.xlane.xlu1 %237 }
 0x1ab   :  { %v269_v22 = vmul.f32 0.0078125, %v238_v19 }
 0x1ad   :  { %v285_v23 = vadd.f32 1e-05, %v269_v22 }
 0x1ae   :  { %v240_v24 = vpop.xlane.xlu1 %239  ;;  %v254_v25 = vpop.xlane.xlu0 %253 }
 0x1af   :  { %662 = vrsqrt.f32 %v285_v23  ;;  %v270_v26 = vmul.f32 0.0078125, %v240_v24  ;;  %v277_v27 = vmul.f32 0.0078125, %v254_v25 }
 0x1b1   :  { %v286_v28 = vadd.f32 1e-05, %v270_v26  ;;  %v293_v31 = vadd.f32 1e-05, %v277_v27 }
 0x1b2   :  { %v242_v32 = vpop.xlane.xlu1 %241  ;;  %v256_v33 = vpop.xlane.xlu0 %255 }
 0x1b3   :  { %664 = vrsqrt.f32 %v286_v28  ;;  %v271_v35 = vmul.f32 0.0078125, %v242_v32  ;;  %v278_v36 = vmul.f32 0.0078125, %v256_v33 }
 0x1b4   :  { %666 = vrsqrt.f32 %v293_v31 }
 0x1b5   :  { %v287_v37 = vadd.f32 1e-05, %v271_v35  ;;  %v294_v38 = vadd.f32 1e-05, %v278_v36 }
 0x1b6   :  { %v244_v41 = vpop.xlane.xlu1 %243  ;;  %v258_v42 = vpop.xlane.xlu0 %257 }
 0x1b7   :  { %668 = vrsqrt.f32 %v287_v37  ;;  %v272_v43 = vmul.f32 0.0078125, %v244_v41  ;;  %v279_v45 = vmul.f32 0.0078125, %v258_v42 }
 0x1b8   :  { %670 = vrsqrt.f32 %v294_v38 }
 0x1b9   :  { %v288_v47 = vadd.f32 1e-05, %v272_v43  ;;  %v295_v48 = vadd.f32 1e-05, %v279_v45 }
 0x1ba   :  { %v246_v44 = vpop.xlane.xlu1 %245  ;;  %v260_v51 = vpop.xlane.xlu0 %259 }
 0x1bb   :  { %672 = vrsqrt.f32 %v288_v47  ;;  %v273_v53 = vmul.f32 0.0078125, %v246_v44  ;;  %v280_v54 = vmul.f32 0.0078125, %v260_v51 }
 0x1bc   :  { %v663_v55 = vpop.eup %662  ;;  %674 = vrsqrt.f32 %v295_v48 }
 0x1bd   :  { %v289_v57 = vadd.f32 1e-05, %v273_v53  ;;  %v296_v59 = vadd.f32 1e-05, %v280_v54  ;;  %v317_v60 = vmul.f32 %v663_v55, %v863_v6 }
 0x1be   :  { %v248_v50 = vpop.xlane.xlu1 %247  ;;  %v262_v0 = vpop.xlane.xlu0 %261 }
 0x1bf   :  { %676 = vrsqrt.f32 %v289_v57  ;;  %v274_v1 = vmul.f32 0.0078125, %v248_v50  ;;  %v281_v2 = vmul.f32 0.0078125, %v262_v0  ;;  %600 = vmatprep.mubr.f32.mxu0 %v317_v60 }
 0x1c0   :  { %v665_v3 = vpop.eup %664  ;;  %678 = vrsqrt.f32 %v296_v59 }
 0x1c1   :  { %v667_v4 = vpop.eup %666  ;;  %v290_v5 = vadd.f32 1e-05, %v274_v1  ;;  %v297_v7 = vadd.f32 1e-05, %v281_v2  ;;  %v318_v52 = vmul.f32 %v665_v3, %v871_v13 }
 0x1c2   :  { %v250_v9 = vpop.xlane.xlu1 %249  ;;  %v264_v10 = vpop.xlane.xlu0 %263  ;;  %v325_v11 = vmul.f32 %v667_v4, %v868_v12 }
 0x1c3   :  { %680 = vrsqrt.f32 %v290_v5  ;;  %v275_v14 = vmul.f32 0.0078125, %v250_v9  ;;  %v282_v6 = vmul.f32 0.0078125, %v264_v10  ;;  %601 = vmatmul.mubr.f32.vlgmr.msra.gmra.mxu0 %v318_v52 }
 0x1c4   :  { %v669_v15 = vpop.eup %668  ;;  %682 = vrsqrt.f32 %v297_v7  ;;  %612 = vmatprep.mubr.f32.mxu1 %v325_v11 }
 0x1c5   :  { %v671_v62 = vpop.eup %670  ;;  %v291_v16 = vadd.f32 1e-05, %v275_v14  ;;  %v298_v17 = vadd.f32 1e-05, %v282_v6  ;;  %v319_v18 = vmul.f32 %v669_v15, %v878_v20 }
 0x1c6   :  { %v252_v63 = vpop.xlane.xlu1 %251  ;;  %v266_v19 = vpop.xlane.xlu0 %265  ;;  %v326_v13 = vmul.f32 %v671_v62, %v881_v21 }
 0x1c7   :  { %684 = vrsqrt.f32 %v291_v16  ;;  %v276_v22 = vmul.f32 0.0078125, %v252_v63  ;;  %v283_v23 = vmul.f32 0.0078125, %v266_v19  ;;  %603 = vmatprep.mubr.f32.mxu0 %v319_v18 }
 0x1c8   :  { %v673_v12 = vpop.eup %672  ;;  %686 = vrsqrt.f32 %v298_v17  ;;  %613 = vmatmul.mubr.f32.vlgmr.msra.gmra.mxu1 %v326_v13 }
 0x1c9   :  { %v675_v24 = vpop.eup %674  ;;  %v292_v25 = vadd.f32 1e-05, %v276_v22  ;;  %v299_v26 = vadd.f32 1e-05, %v283_v23  ;;  %v320_v27 = vmul.f32 %v673_v12, %v888_v29 }
 0x1ca   :  { %v268_v28 = vpop.xlane.xlu0 %267  ;;  %v327_v31 = vmul.f32 %v675_v24, %v891_v30 }
 0x1cb   :  { %688 = vrsqrt.f32 %v292_v25  ;;  %v284_v20 = vmul.f32 0.0078125, %v268_v28  ;;  %604 = vmatmul.mubr.f32.gmra.mxu0 %v320_v27 }
 0x1cc   :  { %v677_v32 = vpop.eup %676  ;;  %690 = vrsqrt.f32 %v299_v26  ;;  %615 = vmatprep.mubr.f32.mxu1 %v327_v31 }
 0x1cd   :  { %v679_v21 = vpop.eup %678  ;;  %v300_v33 = vadd.f32 1e-05, %v284_v20  ;;  %v321_v35 = vmul.f32 %v677_v32, %v898_v34 }
 0x1ce   :  { %v328_v36 = vmul.f32 %v679_v21, %v901_v39 }
 0x1cf   :  { %692 = vrsqrt.f32 %v300_v33  ;;  %606 = vmatprep.mubr.f32.mxu0 %v321_v35 }
 0x1d0   :  { %v681_v37 = vpop.eup %680  ;;  %616 = vmatmul.mubr.f32.gmra.mxu1 %v328_v36 }
 0x1d1   :  { %v683_v29 = vpop.eup %682  ;;  %v322_v38 = vmul.f32 %v681_v37, %v908_v40 }
 0x1d2   :  { %v329_v30 = vmul.f32 %v683_v29, %v911_v49 }
 0x1d3   :  { %607 = vmatmul.mubr.f32.gmra.mxu0 %v322_v38 }
 0x1d4   :  { %v685_v41 = vpop.eup %684  ;;  %618 = vmatprep.mubr.f32.mxu1 %v329_v30 }
 0x1d5   :  { %v687_v42 = vpop.eup %686  ;;  %v323_v43 = vmul.f32 %v685_v41, %v918_v46  ;;  %v535_v46 = vld [vmem:[%s969_s2] ss:$0 sm:$0xff]  ;;  %s765_s2 = smov [#allocation7]  }
 0x1d6   :  { %v330_v45 = vmul.f32 %v687_v42, %v921_v61  ;;  %s522_s25 = sshll.u32 %s765_s2, 4  ;;  %s523_s25 = int_to_ptr.vmem [resolvable:$true] %s522_s25 }
 0x1d7   :  { %609 = vmatprep.mubr.f32.mxu0 %v323_v43  ;;  %s734_s26 = scalar_lea.vmem %s523_s25, 2048  ;;  %p739_p11 = scmp.lt.s32.totalorder %s523_s25, %s523_s25 }
 0x1d8   :  { %v689_v34 = vpop.eup %688  ;;  %619 = vmatmul.mubr.f32.gmra.mxu1 %v330_v45  ;;  %p735_p10 = scmp.ne.s32.totalorder %s523_s25, %s734_s26  ;;  %p740_p12 = scmp.lt.s32.totalorder %s734_s26, %s734_s26 }
 0x1d9   :  { %v691_v39 = vpop.eup %690  ;;  %v324_v47 = vmul.f32 %v689_v34, %v928_v56 }
 0x1da   :  { %v331_v48 = vmul.f32 %v691_v39, %v931_v8  ;;  %p741_p13 = por %p740_p12, %p739_p11 }
 0x1db   :  { %610 = vmatmul.mubr.f32.gmra.mxu0 %v324_v47 }
 0x1dc   :  { %v693_v40 = vpop.eup %692  ;;  %621 = vmatprep.mubr.f32.mxu1 %v331_v48  ;;  %p742_p0 = pnand %p741_p13, %p735_p10 }
 0x1dd   :  { %v332_v49 = vmul.f32 %v693_v40, %v938_v58 }
 0x1df   :  { %622 = vmatmul.mubr.f32.gmra.mxu1 %v332_v49 }
 0x283   :  { %v602_v44 = vpop.f32.mrf.mxu0 }
 0x284   :  { %v428_v61 = vadd.f32 %v602_v44, %v535_v46 }
 0x285   :  { %v422_v51 = vpop.f32.mrf.mxu0 }
 0x286   :  { %502 = vst [vmem:[#allocation7 + $0x8] sm:$0xff] %v428_v61  ;;  %v423_v53 = vadd.f32 %v535_v46, %v422_v51 }
 0x288   :  { %501 = vst [vmem:[#allocation7] sm:$0xff] %v423_v53  ;;  %v614_v54 = vpop.f32.mrf.mxu1 }
 0x289   :  { %v468_v56 = vadd.f32 %v614_v54, %v535_v46 }
 0x28a   :  { %v462_v55 = vpop.f32.mrf.mxu1 }
 0x28b   :  { %510 = vst [vmem:[#allocation7 + $0x48] sm:$0xff] %v468_v56  ;;  %v463_v8 = vadd.f32 %v535_v46, %v462_v55  ;;  %v605_v57 = vpop.f32.mrf.mxu0 }
 0x28c   :  { %v438_v59 = vadd.f32 %v605_v57, %v535_v46 }
 0x28d   :  { %509 = vst [vmem:[#allocation7 + $0x40] sm:$0xff] %v463_v8  ;;  %v432_v58 = vpop.f32.mrf.mxu0 }
 0x28e   :  { %504 = vst [vmem:[#allocation7 + $0x18] sm:$0xff] %v438_v59  ;;  %v433_v60 = vadd.f32 %v535_v46, %v432_v58 }
 0x290   :  { %503 = vst [vmem:[#allocation7 + $0x10] sm:$0xff] %v433_v60  ;;  %v617_v50 = vpop.f32.mrf.mxu1 }
 0x291   :  { %v478_v0 = vadd.f32 %v617_v50, %v535_v46 }
 0x292   :  { %v472_v1 = vpop.f32.mrf.mxu1 }
 0x293   :  { %512 = vst [vmem:[#allocation7 + $0x58] sm:$0xff] %v478_v0  ;;  %v473_v2 = vadd.f32 %v535_v46, %v472_v1  ;;  %v608_v3 = vpop.f32.mrf.mxu0 }
 0x294   :  { %v448_v4 = vadd.f32 %v608_v3, %v535_v46 }
 0x295   :  { %511 = vst [vmem:[#allocation7 + $0x50] sm:$0xff] %v473_v2  ;;  %v442_v5 = vpop.f32.mrf.mxu0 }
 0x296   :  { %506 = vst [vmem:[#allocation7 + $0x28] sm:$0xff] %v448_v4  ;;  %v443_v7 = vadd.f32 %v535_v46, %v442_v5 }
 0x298   :  { %505 = vst [vmem:[#allocation7 + $0x20] sm:$0xff] %v443_v7  ;;  %v620_v52 = vpop.f32.mrf.mxu1 }
 0x299   :  { %v488_v9 = vadd.f32 %v620_v52, %v535_v46 }
 0x29a   :  { %v482_v10 = vpop.f32.mrf.mxu1 }
 0x29b   :  { %514 = vst [vmem:[#allocation7 + $0x68] sm:$0xff] %v488_v9  ;;  %v483_v11 = vadd.f32 %v535_v46, %v482_v10  ;;  %v611_v14 = vpop.f32.mrf.mxu0 }
 0x29c   :  { %v458_v6 = vadd.f32 %v611_v14, %v535_v46 }
 0x29d   :  { %513 = vst [vmem:[#allocation7 + $0x60] sm:$0xff] %v483_v11  ;;  %v452_v15 = vpop.f32.mrf.mxu0 }
 0x29e   :  { %508 = vst [vmem:[#allocation7 + $0x38] sm:$0xff] %v458_v6  ;;  %v453_v62 = vadd.f32 %v535_v46, %v452_v15 }
 0x29f   :  { %v623_v16 = vpop.f32.mrf.mxu1 }
 0x2a0   :  { %507 = vst [vmem:[#allocation7 + $0x30] sm:$0xff] %v453_v62  ;;  %v498_v17 = vadd.f32 %v623_v16, %v535_v46 }
 0x2a1   :  { %v492_v18 = vpop.f32.mrf.mxu1 }
 0x2a2   :  { %516 = vst [vmem:[#allocation7 + $0x78] sm:$0xff] %v498_v17  ;;  %v493_v63 = vadd.f32 %v535_v46, %v492_v18 }
 0x2a4   :  { %515 = vst [vmem:[#allocation7 + $0x70] sm:$0xff] %v493_v63 }
 0x2a5   :  { %745 = shalt.err (!%p742_p0)
}
 0x2a6   :  { %528 = dma.vmem_to_hbm [thread:$0]  %s523_s25, 2048, %s970_s3, [#allocation4], %s761_s15, %s761_s15, %s762_s16  }
 0x2a7   :  { %758 = dma.done.wait [#allocation4], 2048  }
 0x2a8   :  { %759 = vsyncadd [#allocation4], 4294965248 }
 0x2a9   :  { %532 = vsyncpa [#allocation3], 1 }
 0x2aa   :  { %533 = vsyncpa [#allocation6], 1 }
 0x2ab   :  { %534 = vsyncpa [#allocation4], 1 }

</bundles_post_ra>
